<compile_context>
chip_gen: v5e
topology: v5e:2x2
jax: 0.10.0
libtpu: 0.0.40
codegen_flags: <defaults>
</compile_context>

<pallas_src>
import functools

import jax
import jax.numpy as jnp
from jax.experimental import pallas as pl
from jax.experimental.pallas import tpu as pltpu


# --------------------------------------------------------------------------
# Shared per-layer math
# --------------------------------------------------------------------------
def _coupling_step(cond, trans, ldacc, w1, b1, w2s, b2s, w2t, b2t, hidden):
    """One affine-coupling layer.

    `cond` conditions the scale/translate nets, `trans` is transformed:
        y = trans * exp(s(cond)) + t(cond),   log|det J| += sum(s).
    Returns the next layer's (cond, trans, ldacc) = (y, cond, ldacc + s).
    """
    # Fused first net: one (half, 2H) matmul produces both hidden activations.
    h = jnp.tanh(
        jnp.dot(cond.astype(w1.dtype), w1, preferred_element_type=jnp.float32)
        + b1.astype(jnp.float32))
    # Second net as TWO dense matmuls (no block-diagonal zero padding -> no
    # wasted MXU MACs at production sizes).
    hs = h[:, :hidden]
    ht = h[:, hidden:]
    s = jnp.tanh(
        jnp.dot(hs.astype(w2s.dtype), w2s, preferred_element_type=jnp.float32)
        + b2s.astype(jnp.float32))
    t = (jnp.dot(ht.astype(w2t.dtype), w2t, preferred_element_type=jnp.float32)
         + b2t.astype(jnp.float32))
    y = trans * jnp.exp(s) + t
    return y, cond, ldacc + s


def _store_output(x_ref, first, second, half):
    if half % 128 == 0:
        # Lane-aligned: store each half directly (no concat temp / relayout).
        x_ref[:, :half] = first.astype(x_ref.dtype)
        x_ref[:, half:] = second.astype(x_ref.dtype)
    else:
        x_ref[...] = jnp.concatenate([first, second], axis=-1).astype(x_ref.dtype)


# --------------------------------------------------------------------------
# Kernels
# --------------------------------------------------------------------------
def _flow_resident_kernel(z_ref, w1_ref, b1_ref, w2s_ref, b2s_ref, w2t_ref,
                          b2t_ref, x_ref, ld_ref, *, half, hidden, num_layers):
    """All L layers' weights resident in VMEM; layers iterated in-kernel."""
    z = z_ref[...].astype(jnp.float32)
    cond = z[:, :half]
    trans = z[:, half:]
    ldacc = jnp.zeros((z.shape[0], half), jnp.float32)

    def layer(l, carry):
        c, t, ld = carry
        return _coupling_step(c, t, ld,
                              w1_ref[l], b1_ref[l],
                              w2s_ref[l], b2s_ref[l],
                              w2t_ref[l], b2t_ref[l],
                              hidden)

    if num_layers <= 16:
        carry = (cond, trans, ldacc)
        for l in range(num_layers):      # fully unrolled, static weight indices
            carry = layer(l, carry)
        cond, trans, ldacc = carry
    else:
        cond, trans, ldacc = jax.lax.fori_loop(
            0, num_layers, layer, (cond, trans, ldacc))

    if num_layers % 2 == 0:              # static python branch
        first, second = cond, trans
    else:
        first, second = trans, cond
    _store_output(x_ref, first, second, half)
    ld_ref[...] = jnp.sum(ldacc, axis=-1, keepdims=True)


def _flow_streamed_kernel(z_ref, w1_ref, b1_ref, w2s_ref, b2s_ref, w2t_ref,
                          b2t_ref, x_ref, ld_ref, state_ref, ldacc_ref,
                          *, half, hidden, num_layers):
    """Per-layer weights streamed via the grid's layer axis (fallback path)."""
    l = pl.program_id(1)

    @pl.when(l == 0)
    def _init():
        z = z_ref[...].astype(jnp.float32)
        state_ref[0] = z[:, :half]       # conditioning half for layer 0
        state_ref[1] = z[:, half:]       # transformed half for layer 0
        ldacc_ref[...] = jnp.zeros_like(ldacc_ref)

    y, new_trans, ld = _coupling_step(
        state_ref[0], state_ref[1], ldacc_ref[...],
        w1_ref[0], b1_ref[0], w2s_ref[0], b2s_ref[0], w2t_ref[0], b2t_ref[0],
        hidden)
    state_ref[0] = y
    state_ref[1] = new_trans
    ldacc_ref[...] = ld

    @pl.when(l == num_layers - 1)
    def _finalize():
        if num_layers % 2 == 0:          # static python branch
            first, second = state_ref[0], state_ref[1]
        else:
            first, second = state_ref[1], state_ref[0]
        _store_output(x_ref, first, second, half)
        ld_ref[...] = jnp.sum(ldacc_ref[...], axis=-1, keepdims=True)


# --------------------------------------------------------------------------
# Wrapper
# --------------------------------------------------------------------------
def _round_up(x, m):
    return ((x + m - 1) // m) * m


def _vmem_capacity_bytes():
    try:
        return int(pltpu.get_tpu_info().vmem_capacity_bytes)
    except Exception:
        return 64 * 1024 * 1024          # conservative default (v7x per-core)


def _pack_params(params, weight_dtype):
    w1 = jnp.concatenate([params["w1s"], params["w1t"]], axis=-1)  # (L, half, 2H)
    b1 = jnp.concatenate([params["b1s"], params["b1t"]], axis=-1)  # (L, 1, 2H)
    return (w1.astype(weight_dtype), b1.astype(weight_dtype),
            params["w2s"].astype(weight_dtype), params["b2s"].astype(weight_dtype),
            params["w2t"].astype(weight_dtype), params["b2t"].astype(weight_dtype))


def _choose_batch_tile(B, D, half, batch_vmem_budget):
    # Rough per padded row: double-buffered z & x blocks, ld block, carried
    # state / scratch halves.
    per_row_bytes = 4 * (4 * D + 8 * half + 16)
    cap = max(8, batch_vmem_budget // per_row_bytes)
    tb = min(_round_up(B, 8), 1024, cap)
    return max(8, (tb // 8) * 8)


def realnvp_flow_forward(z, params, *, weight_dtype=jnp.float32, mode="auto"):
    """Flow.forward: (x, log_det) from chaining L affine-coupling layers.

    mode: "auto" | "resident" | "streamed".
    For best MXU / store efficiency choose model dims with `half` and
    `hidden` multiples of 128 (256 preferred on v6e/v7x); pass
    weight_dtype=jnp.bfloat16 to halve weight DMA traffic (f32 accumulation).
    """
    B, D = z.shape
    L, half_w, hidden = params["w1s"].shape
    half = D // 2
    assert D == 2 * half and half_w == half

    packed = _pack_params(params, weight_dtype)
    w1, b1, w2s, b2s, w2t, b2t = packed
    weight_bytes = sum(int(a.size) * a.dtype.itemsize for a in packed)

    vmem_cap = _vmem_capacity_bytes()
    if mode == "resident":
        use_resident = True
    elif mode == "streamed":
        use_resident = False
    else:
        use_resident = 2 * weight_bytes <= int(0.30 * vmem_cap)

    tb = _choose_batch_tile(B, D, half, int(0.30 * vmem_cap))
    if use_resident and tb >= 256 and _round_up(B, 8) <= tb:
        # Keep >= 2 batch blocks so the "parallel" axis can split across the
        # two TensorCores on v7x (near-free elsewhere: weights are resident,
        # the extra block costs only one grid step).
        tb = max(8, _round_up(tb // 2, 8))
    nb = -(-B // tb)
    Bp = nb * tb
    z_p = jnp.pad(z, ((0, Bp - B), (0, 0))) if Bp != B else z

    # VMEM limit from actual buffer sizes (+headroom), capped per part.
    weights_vmem = (2 * weight_bytes if use_resident
                    else 3 * (weight_bytes // max(L, 1)))
    batch_vmem = 4 * tb * (4 * D + 8 * half + 16)
    vmem_limit = int(min(max(2 * (weights_vmem + batch_vmem) + (8 << 20), 32 << 20),
                         int(0.8 * vmem_cap)))

    flops = 2 * Bp * L * 4 * hidden * half
    transcendentals = Bp * L * (2 * hidden + 2 * half)
    bytes_accessed = (int(z_p.size) * 4
                      + weight_bytes * (1 if use_resident else nb)
                      + Bp * D * 4 + Bp * 4)
    cost = pl.CostEstimate(flops=flops, transcendentals=transcendentals,
                           bytes_accessed=bytes_accessed)

    out_shape = (jax.ShapeDtypeStruct((Bp, D), jnp.float32),
                 jax.ShapeDtypeStruct((Bp, 1), jnp.float32))

    if use_resident:
        kernel = functools.partial(_flow_resident_kernel, half=half,
                                   hidden=hidden, num_layers=L)
        grid_spec = pltpu.PrefetchScalarGridSpec(
            num_scalar_prefetch=0,
            grid=(nb,),
            in_specs=[
                pl.BlockSpec((tb, D), lambda b: (b, 0)),                # z
                pl.BlockSpec((L, half, 2 * hidden), lambda b: (0, 0, 0)),  # W1 (resident)
                pl.BlockSpec((L, 1, 2 * hidden), lambda b: (0, 0, 0)),     # b1
                pl.BlockSpec((L, hidden, half), lambda b: (0, 0, 0)),      # W2s
                pl.BlockSpec((L, 1, half), lambda b: (0, 0, 0)),           # b2s
                pl.BlockSpec((L, hidden, half), lambda b: (0, 0, 0)),      # W2t
                pl.BlockSpec((L, 1, half), lambda b: (0, 0, 0)),           # b2t
            ],
            out_specs=(pl.BlockSpec((tb, D), lambda b: (b, 0)),
                       pl.BlockSpec((tb, 1), lambda b: (b, 0))),
        )
        dim_sem = ("parallel",)
    else:
        kernel = functools.partial(_flow_streamed_kernel, half=half,
                                   hidden=hidden, num_layers=L)
        grid_spec = pltpu.PrefetchScalarGridSpec(
            num_scalar_prefetch=0,
            grid=(nb, L),
            in_specs=[
                pl.BlockSpec((tb, D), lambda b, l: (b, 0)),             # z (resident per b)
                pl.BlockSpec((1, half, 2 * hidden), lambda b, l: (l, 0, 0),
                             pipeline_mode=pl.Buffered(3)),             # W1 (streamed)
                pl.BlockSpec((1, 1, 2 * hidden), lambda b, l: (l, 0, 0)),   # b1
                pl.BlockSpec((1, hidden, half), lambda b, l: (l, 0, 0),
                             pipeline_mode=pl.Buffered(3)),             # W2s
                pl.BlockSpec((1, 1, half), lambda b, l: (l, 0, 0)),         # b2s
                pl.BlockSpec((1, hidden, half), lambda b, l: (l, 0, 0),
                             pipeline_mode=pl.Buffered(3)),             # W2t
                pl.BlockSpec((1, 1, half), lambda b, l: (l, 0, 0)),         # b2t
            ],
            out_specs=(pl.BlockSpec((tb, D), lambda b, l: (b, 0)),
                       pl.BlockSpec((tb, 1), lambda b, l: (b, 0))),
            scratch_shapes=[
                pltpu.VMEM((2, tb, half), jnp.float32),   # running state halves
                pltpu.VMEM((tb, half), jnp.float32),      # log-det accumulator
            ],
        )
        dim_sem = ("parallel", "arbitrary")

    x_p, ld_p = pl.pallas_call(
        kernel,
        out_shape=out_shape,
        grid_spec=grid_spec,
        compiler_params=pltpu.CompilerParams(
            dimension_semantics=dim_sem,
            vmem_limit_bytes=vmem_limit),
        cost_estimate=cost,
    )(z_p, w1, b1, w2s, b2s, w2t, b2t)

    return x_p[:B], ld_p[:B]


# --------------------------------------------------------------------------
# Parameters + pure-JAX reference (mirrors Flow.forward semantics)
# --------------------------------------------------------------------------
def make_params(key, num_layers, dim, hidden):
    half = dim // 2
    ks = jax.random.split(key, 8)
    scale = 0.1
    return {
        "w1s": scale * jax.random.normal(ks[0], (num_layers, half, hidden), jnp.float32),
        "b1s": scale * jax.random.normal(ks[1], (num_layers, 1, hidden), jnp.float32),
        "w2s": scale * jax.random.normal(ks[2], (num_layers, hidden, half), jnp.float32),
        "b2s": scale * jax.random.normal(ks[3], (num_layers, 1, half), jnp.float32),
        "w1t": scale * jax.random.normal(ks[4], (num_layers, half, hidden), jnp.float32),
        "b1t": scale * jax.random.normal(ks[5], (num_layers, 1, hidden), jnp.float32),
        "w2t": scale * jax.random.normal(ks[6], (num_layers, hidden, half), jnp.float32),
        "b2t": scale * jax.random.normal(ks[7], (num_layers, 1, half), jnp.float32),
    }


def reference_forward(z, params):
    out = z
    L = params["w1s"].shape[0]
    half = z.shape[-1] // 2
    ld = jnp.zeros((z.shape[0], 1), jnp.float32)
    for l in range(L):
        if l % 2 == 0:
            cond, trans = out[:, :half], out[:, half:]
        else:
            cond, trans = out[:, half:], out[:, :half]
        hs = jnp.tanh(cond @ params["w1s"][l] + params["b1s"][l])
        s = jnp.tanh(hs @ params["w2s"][l] + params["b2s"][l])
        ht = jnp.tanh(cond @ params["w1t"][l] + params["b1t"][l])
        t = ht @ params["w2t"][l] + params["b2t"][l]
        y = trans * jnp.exp(s) + t
        out = (jnp.concatenate([cond, y], -1) if l % 2 == 0
               else jnp.concatenate([y, cond], -1))
        ld = ld + jnp.sum(s, axis=-1, keepdims=True)
    return out, ld


# --------------------------------------------------------------------------
if __name__ == "__main__":
    key = jax.random.PRNGKey(0)
    kz, kp, kp3 = jax.random.split(key, 3)

    B, D, H, L = 8, 32, 32, 4
    z = jax.random.normal(kz, (B, D), jnp.float32)

    params = make_params(kp, L, D, H)
    x_ref, ld_ref = reference_forward(z, params)

    # Resident-weights fast path (auto-selected: these weights easily fit VMEM).
    x, ld = realnvp_flow_forward(z, params, mode="auto")
    jax.block_until_ready((x, ld))
    assert x.shape == (B, D) and ld.shape == (B, 1)
    assert jnp.allclose(x, x_ref, atol=1e-5, rtol=1e-5)
    assert jnp.allclose(ld, ld_ref, atol=1e-5, rtol=1e-5)

    # Layer-streamed fallback path (what very large L / hidden would use).
    x_s, ld_s = realnvp_flow_forward(z, params, mode="streamed")
    jax.block_until_ready((x_s, ld_s))
    assert jnp.allclose(x_s, x_ref, atol=1e-5, rtol=1e-5)
    assert jnp.allclose(ld_s, ld_ref, atol=1e-5, rtol=1e-5)

    # Odd layer count (exercises the final half-ordering parity).
    params3 = make_params(kp3, 3, D, H)
    x3_ref, ld3_ref = reference_forward(z, params3)
    x3, ld3 = realnvp_flow_forward(z, params3, mode="resident")
    jax.block_until_ready((x3, ld3))
    assert jnp.allclose(x3, x3_ref, atol=1e-5, rtol=1e-5)
    assert jnp.allclose(ld3, ld3_ref, atol=1e-5, rtol=1e-5)

    print("KERNEL_OK")
</pallas_src>

<mosaic_0001>
module attributes {stable_mosaic.version = 11 : i64} {
  func.func @_flow_resident_kernel(%arg0: i32, %arg1: memref<8x32xf32, #tpu.memory_space<vmem>>, %arg2: memref<4x16x64xf32, #tpu.memory_space<vmem>>, %arg3: memref<4x1x64xf32, #tpu.memory_space<vmem>>, %arg4: memref<4x32x16xf32, #tpu.memory_space<vmem>>, %arg5: memref<4x1x16xf32, #tpu.memory_space<vmem>>, %arg6: memref<4x32x16xf32, #tpu.memory_space<vmem>>, %arg7: memref<4x1x16xf32, #tpu.memory_space<vmem>>, %arg8: memref<8x32xf32, #tpu.memory_space<vmem>>, %arg9: memref<8x1xf32, #tpu.memory_space<vmem>>) attributes {dimension_semantics = [#tpu.dimension_semantics<parallel>], iteration_bounds = array<i64: 1>, scalar_prefetch = 0 : i64, scratch_operands = 0 : i64, tpu.core_type = #tpu.core_type<tc>, window_params = [{transform_indices = @transform_0, window_bounds = array<i64: 8, 32>}, {pipeline_mode = #tpu.pipeline_mode<synchronous>, transform_indices = @transform_1, window_bounds = array<i64: 4, 16, 64>}, {pipeline_mode = #tpu.pipeline_mode<synchronous>, transform_indices = @transform_2, window_bounds = array<i64: 4, 1, 64>}, {pipeline_mode = #tpu.pipeline_mode<synchronous>, transform_indices = @transform_3, window_bounds = array<i64: 4, 32, 16>}, {pipeline_mode = #tpu.pipeline_mode<synchronous>, transform_indices = @transform_4, window_bounds = array<i64: 4, 1, 16>}, {pipeline_mode = #tpu.pipeline_mode<synchronous>, transform_indices = @transform_5, window_bounds = array<i64: 4, 32, 16>}, {pipeline_mode = #tpu.pipeline_mode<synchronous>, transform_indices = @transform_6, window_bounds = array<i64: 4, 1, 16>}, {transform_indices = @transform_7, window_bounds = array<i64: 8, 32>}, {transform_indices = @transform_8, window_bounds = array<i64: 8, 1>}]} {
    %c0 = arith.constant 0 : index
    %c0_0 = arith.constant 0 : index
    %0 = vector.load %arg1[%c0, %c0_0] : memref<8x32xf32, #tpu.memory_space<vmem>>, vector<8x32xf32>
    %1 = vector.extract_strided_slice %0 {offsets = [0, 0], sizes = [8, 16], strides = [1, 1]} : vector<8x32xf32> to vector<8x16xf32>
    %2 = vector.extract_strided_slice %0 {offsets = [0, 16], sizes = [8, 16], strides = [1, 1]} : vector<8x32xf32> to vector<8x16xf32>
    %cst = arith.constant 0.000000e+00 : f32
    %3 = vector.broadcast %cst : f32 to vector<8x16xf32>
    %c0_1 = arith.constant 0 : index
    %c0_2 = arith.constant 0 : index
    %c0_3 = arith.constant 0 : index
    %4 = vector.load %arg2[%c0_1, %c0_2, %c0_3] : memref<4x16x64xf32, #tpu.memory_space<vmem>>, vector<1x16x64xf32>
    %5 = vector.shape_cast %4 : vector<1x16x64xf32> to vector<16x64xf32>
    %c0_4 = arith.constant 0 : index
    %c0_5 = arith.constant 0 : index
    %c0_6 = arith.constant 0 : index
    %6 = vector.load %arg3[%c0_4, %c0_5, %c0_6] : memref<4x1x64xf32, #tpu.memory_space<vmem>>, vector<1x1x64xf32>
    %7 = vector.shape_cast %6 : vector<1x1x64xf32> to vector<1x64xf32>
    %c0_7 = arith.constant 0 : index
    %c0_8 = arith.constant 0 : index
    %c0_9 = arith.constant 0 : index
    %8 = vector.load %arg4[%c0_7, %c0_8, %c0_9] : memref<4x32x16xf32, #tpu.memory_space<vmem>>, vector<1x32x16xf32>
    %9 = vector.shape_cast %8 : vector<1x32x16xf32> to vector<32x16xf32>
    %c0_10 = arith.constant 0 : index
    %c0_11 = arith.constant 0 : index
    %c0_12 = arith.constant 0 : index
    %10 = vector.load %arg5[%c0_10, %c0_11, %c0_12] : memref<4x1x16xf32, #tpu.memory_space<vmem>>, vector<1x1x16xf32>
    %11 = vector.shape_cast %10 : vector<1x1x16xf32> to vector<1x16xf32>
    %c0_13 = arith.constant 0 : index
    %c0_14 = arith.constant 0 : index
    %c0_15 = arith.constant 0 : index
    %12 = vector.load %arg6[%c0_13, %c0_14, %c0_15] : memref<4x32x16xf32, #tpu.memory_space<vmem>>, vector<1x32x16xf32>
    %13 = vector.shape_cast %12 : vector<1x32x16xf32> to vector<32x16xf32>
    %c0_16 = arith.constant 0 : index
    %c0_17 = arith.constant 0 : index
    %c0_18 = arith.constant 0 : index
    %14 = vector.load %arg7[%c0_16, %c0_17, %c0_18] : memref<4x1x16xf32, #tpu.memory_space<vmem>>, vector<1x1x16xf32>
    %15 = vector.shape_cast %14 : vector<1x1x16xf32> to vector<1x16xf32>
    %cst_19 = arith.constant dense<0.000000e+00> : vector<8x64xf32>
    %16 = tpu.matmul %1, %5, %cst_19 {dimension_numbers = #tpu.dot_dimension_numbers<[1], [0], [0], [1], [0, 0, 1, 1], [], []>} : vector<8x16xf32>, vector<16x64xf32>, vector<8x64xf32> -> vector<8x64xf32>
    %17 = vector.broadcast %7 : vector<1x64xf32> to vector<8x64xf32>
    %18 = arith.addf %16, %17 : vector<8x64xf32>
    %19 = math.tanh %18 : vector<8x64xf32>
    %20 = vector.extract_strided_slice %19 {offsets = [0, 0], sizes = [8, 32], strides = [1, 1]} : vector<8x64xf32> to vector<8x32xf32>
    %21 = vector.extract_strided_slice %19 {offsets = [0, 32], sizes = [8, 32], strides = [1, 1]} : vector<8x64xf32> to vector<8x32xf32>
    %cst_20 = arith.constant dense<0.000000e+00> : vector<8x16xf32>
    %22 = tpu.matmul %20, %9, %cst_20 {dimension_numbers = #tpu.dot_dimension_numbers<[1], [0], [0], [1], [0, 0, 1, 1], [], []>} : vector<8x32xf32>, vector<32x16xf32>, vector<8x16xf32> -> vector<8x16xf32>
    %23 = vector.broadcast %11 : vector<1x16xf32> to vector<8x16xf32>
    %24 = arith.addf %22, %23 : vector<8x16xf32>
    %25 = math.tanh %24 : vector<8x16xf32>
    %cst_21 = arith.constant dense<0.000000e+00> : vector<8x16xf32>
    %26 = tpu.matmul %21, %13, %cst_21 {dimension_numbers = #tpu.dot_dimension_numbers<[1], [0], [0], [1], [0, 0, 1, 1], [], []>} : vector<8x32xf32>, vector<32x16xf32>, vector<8x16xf32> -> vector<8x16xf32>
    %27 = vector.broadcast %15 : vector<1x16xf32> to vector<8x16xf32>
    %28 = arith.addf %26, %27 : vector<8x16xf32>
    %29 = math.exp %25 : vector<8x16xf32>
    %30 = arith.mulf %2, %29 : vector<8x16xf32>
    %31 = arith.addf %30, %28 : vector<8x16xf32>
    %32 = arith.addf %3, %25 : vector<8x16xf32>
    %c1 = arith.constant 1 : index
    %c0_22 = arith.constant 0 : index
    %c0_23 = arith.constant 0 : index
    %33 = vector.load %arg2[%c1, %c0_22, %c0_23] : memref<4x16x64xf32, #tpu.memory_space<vmem>>, vector<1x16x64xf32>
    %34 = vector.shape_cast %33 : vector<1x16x64xf32> to vector<16x64xf32>
    %c1_24 = arith.constant 1 : index
    %c0_25 = arith.constant 0 : index
    %c0_26 = arith.constant 0 : index
    %35 = vector.load %arg3[%c1_24, %c0_25, %c0_26] : memref<4x1x64xf32, #tpu.memory_space<vmem>>, vector<1x1x64xf32>
    %36 = vector.shape_cast %35 : vector<1x1x64xf32> to vector<1x64xf32>
    %c1_27 = arith.constant 1 : index
    %c0_28 = arith.constant 0 : index
    %c0_29 = arith.constant 0 : index
    %37 = vector.load %arg4[%c1_27, %c0_28, %c0_29] : memref<4x32x16xf32, #tpu.memory_space<vmem>>, vector<1x32x16xf32>
    %38 = vector.shape_cast %37 : vector<1x32x16xf32> to vector<32x16xf32>
    %c1_30 = arith.constant 1 : index
    %c0_31 = arith.constant 0 : index
    %c0_32 = arith.constant 0 : index
    %39 = vector.load %arg5[%c1_30, %c0_31, %c0_32] : memref<4x1x16xf32, #tpu.memory_space<vmem>>, vector<1x1x16xf32>
    %40 = vector.shape_cast %39 : vector<1x1x16xf32> to vector<1x16xf32>
    %c1_33 = arith.constant 1 : index
    %c0_34 = arith.constant 0 : index
    %c0_35 = arith.constant 0 : index
    %41 = vector.load %arg6[%c1_33, %c0_34, %c0_35] : memref<4x32x16xf32, #tpu.memory_space<vmem>>, vector<1x32x16xf32>
    %42 = vector.shape_cast %41 : vector<1x32x16xf32> to vector<32x16xf32>
    %c1_36 = arith.constant 1 : index
    %c0_37 = arith.constant 0 : index
    %c0_38 = arith.constant 0 : index
    %43 = vector.load %arg7[%c1_36, %c0_37, %c0_38] : memref<4x1x16xf32, #tpu.memory_space<vmem>>, vector<1x1x16xf32>
    %44 = vector.shape_cast %43 : vector<1x1x16xf32> to vector<1x16xf32>
    %cst_39 = arith.constant dense<0.000000e+00> : vector<8x64xf32>
    %45 = tpu.matmul %31, %34, %cst_39 {dimension_numbers = #tpu.dot_dimension_numbers<[1], [0], [0], [1], [0, 0, 1, 1], [], []>} : vector<8x16xf32>, vector<16x64xf32>, vector<8x64xf32> -> vector<8x64xf32>
    %46 = vector.broadcast %36 : vector<1x64xf32> to vector<8x64xf32>
    %47 = arith.addf %45, %46 : vector<8x64xf32>
    %48 = math.tanh %47 : vector<8x64xf32>
    %49 = vector.extract_strided_slice %48 {offsets = [0, 0], sizes = [8, 32], strides = [1, 1]} : vector<8x64xf32> to vector<8x32xf32>
    %50 = vector.extract_strided_slice %48 {offsets = [0, 32], sizes = [8, 32], strides = [1, 1]} : vector<8x64xf32> to vector<8x32xf32>
    %cst_40 = arith.constant dense<0.000000e+00> : vector<8x16xf32>
    %51 = tpu.matmul %49, %38, %cst_40 {dimension_numbers = #tpu.dot_dimension_numbers<[1], [0], [0], [1], [0, 0, 1, 1], [], []>} : vector<8x32xf32>, vector<32x16xf32>, vector<8x16xf32> -> vector<8x16xf32>
    %52 = vector.broadcast %40 : vector<1x16xf32> to vector<8x16xf32>
    %53 = arith.addf %51, %52 : vector<8x16xf32>
    %54 = math.tanh %53 : vector<8x16xf32>
    %cst_41 = arith.constant dense<0.000000e+00> : vector<8x16xf32>
    %55 = tpu.matmul %50, %42, %cst_41 {dimension_numbers = #tpu.dot_dimension_numbers<[1], [0], [0], [1], [0, 0, 1, 1], [], []>} : vector<8x32xf32>, vector<32x16xf32>, vector<8x16xf32> -> vector<8x16xf32>
    %56 = vector.broadcast %44 : vector<1x16xf32> to vector<8x16xf32>
    %57 = arith.addf %55, %56 : vector<8x16xf32>
    %58 = math.exp %54 : vector<8x16xf32>
    %59 = arith.mulf %1, %58 : vector<8x16xf32>
    %60 = arith.addf %59, %57 : vector<8x16xf32>
    %61 = arith.addf %32, %54 : vector<8x16xf32>
    %c2 = arith.constant 2 : index
    %c0_42 = arith.constant 0 : index
    %c0_43 = arith.constant 0 : index
    %62 = vector.load %arg2[%c2, %c0_42, %c0_43] : memref<4x16x64xf32, #tpu.memory_space<vmem>>, vector<1x16x64xf32>
    %63 = vector.shape_cast %62 : vector<1x16x64xf32> to vector<16x64xf32>
    %c2_44 = arith.constant 2 : index
    %c0_45 = arith.constant 0 : index
    %c0_46 = arith.constant 0 : index
    %64 = vector.load %arg3[%c2_44, %c0_45, %c0_46] : memref<4x1x64xf32, #tpu.memory_space<vmem>>, vector<1x1x64xf32>
    %65 = vector.shape_cast %64 : vector<1x1x64xf32> to vector<1x64xf32>
    %c2_47 = arith.constant 2 : index
    %c0_48 = arith.constant 0 : index
    %c0_49 = arith.constant 0 : index
    %66 = vector.load %arg4[%c2_47, %c0_48, %c0_49] : memref<4x32x16xf32, #tpu.memory_space<vmem>>, vector<1x32x16xf32>
    %67 = vector.shape_cast %66 : vector<1x32x16xf32> to vector<32x16xf32>
    %c2_50 = arith.constant 2 : index
    %c0_51 = arith.constant 0 : index
    %c0_52 = arith.constant 0 : index
    %68 = vector.load %arg5[%c2_50, %c0_51, %c0_52] : memref<4x1x16xf32, #tpu.memory_space<vmem>>, vector<1x1x16xf32>
    %69 = vector.shape_cast %68 : vector<1x1x16xf32> to vector<1x16xf32>
    %c2_53 = arith.constant 2 : index
    %c0_54 = arith.constant 0 : index
    %c0_55 = arith.constant 0 : index
    %70 = vector.load %arg6[%c2_53, %c0_54, %c0_55] : memref<4x32x16xf32, #tpu.memory_space<vmem>>, vector<1x32x16xf32>
    %71 = vector.shape_cast %70 : vector<1x32x16xf32> to vector<32x16xf32>
    %c2_56 = arith.constant 2 : index
    %c0_57 = arith.constant 0 : index
    %c0_58 = arith.constant 0 : index
    %72 = vector.load %arg7[%c2_56, %c0_57, %c0_58] : memref<4x1x16xf32, #tpu.memory_space<vmem>>, vector<1x1x16xf32>
    %73 = vector.shape_cast %72 : vector<1x1x16xf32> to vector<1x16xf32>
    %cst_59 = arith.constant dense<0.000000e+00> : vector<8x64xf32>
    %74 = tpu.matmul %60, %63, %cst_59 {dimension_numbers = #tpu.dot_dimension_numbers<[1], [0], [0], [1], [0, 0, 1, 1], [], []>} : vector<8x16xf32>, vector<16x64xf32>, vector<8x64xf32> -> vector<8x64xf32>
    %75 = vector.broadcast %65 : vector<1x64xf32> to vector<8x64xf32>
    %76 = arith.addf %74, %75 : vector<8x64xf32>
    %77 = math.tanh %76 : vector<8x64xf32>
    %78 = vector.extract_strided_slice %77 {offsets = [0, 0], sizes = [8, 32], strides = [1, 1]} : vector<8x64xf32> to vector<8x32xf32>
    %79 = vector.extract_strided_slice %77 {offsets = [0, 32], sizes = [8, 32], strides = [1, 1]} : vector<8x64xf32> to vector<8x32xf32>
    %cst_60 = arith.constant dense<0.000000e+00> : vector<8x16xf32>
    %80 = tpu.matmul %78, %67, %cst_60 {dimension_numbers = #tpu.dot_dimension_numbers<[1], [0], [0], [1], [0, 0, 1, 1], [], []>} : vector<8x32xf32>, vector<32x16xf32>, vector<8x16xf32> -> vector<8x16xf32>
    %81 = vector.broadcast %69 : vector<1x16xf32> to vector<8x16xf32>
    %82 = arith.addf %80, %81 : vector<8x16xf32>
    %83 = math.tanh %82 : vector<8x16xf32>
    %cst_61 = arith.constant dense<0.000000e+00> : vector<8x16xf32>
    %84 = tpu.matmul %79, %71, %cst_61 {dimension_numbers = #tpu.dot_dimension_numbers<[1], [0], [0], [1], [0, 0, 1, 1], [], []>} : vector<8x32xf32>, vector<32x16xf32>, vector<8x16xf32> -> vector<8x16xf32>
    %85 = vector.broadcast %73 : vector<1x16xf32> to vector<8x16xf32>
    %86 = arith.addf %84, %85 : vector<8x16xf32>
    %87 = math.exp %83 : vector<8x16xf32>
    %88 = arith.mulf %31, %87 : vector<8x16xf32>
    %89 = arith.addf %88, %86 : vector<8x16xf32>
    %90 = arith.addf %61, %83 : vector<8x16xf32>
    %c3 = arith.constant 3 : index
    %c0_62 = arith.constant 0 : index
    %c0_63 = arith.constant 0 : index
    %91 = vector.load %arg2[%c3, %c0_62, %c0_63] : memref<4x16x64xf32, #tpu.memory_space<vmem>>, vector<1x16x64xf32>
    %92 = vector.shape_cast %91 : vector<1x16x64xf32> to vector<16x64xf32>
    %c3_64 = arith.constant 3 : index
    %c0_65 = arith.constant 0 : index
    %c0_66 = arith.constant 0 : index
    %93 = vector.load %arg3[%c3_64, %c0_65, %c0_66] : memref<4x1x64xf32, #tpu.memory_space<vmem>>, vector<1x1x64xf32>
    %94 = vector.shape_cast %93 : vector<1x1x64xf32> to vector<1x64xf32>
    %c3_67 = arith.constant 3 : index
    %c0_68 = arith.constant 0 : index
    %c0_69 = arith.constant 0 : index
    %95 = vector.load %arg4[%c3_67, %c0_68, %c0_69] : memref<4x32x16xf32, #tpu.memory_space<vmem>>, vector<1x32x16xf32>
    %96 = vector.shape_cast %95 : vector<1x32x16xf32> to vector<32x16xf32>
    %c3_70 = arith.constant 3 : index
    %c0_71 = arith.constant 0 : index
    %c0_72 = arith.constant 0 : index
    %97 = vector.load %arg5[%c3_70, %c0_71, %c0_72] : memref<4x1x16xf32, #tpu.memory_space<vmem>>, vector<1x1x16xf32>
    %98 = vector.shape_cast %97 : vector<1x1x16xf32> to vector<1x16xf32>
    %c3_73 = arith.constant 3 : index
    %c0_74 = arith.constant 0 : index
    %c0_75 = arith.constant 0 : index
    %99 = vector.load %arg6[%c3_73, %c0_74, %c0_75] : memref<4x32x16xf32, #tpu.memory_space<vmem>>, vector<1x32x16xf32>
    %100 = vector.shape_cast %99 : vector<1x32x16xf32> to vector<32x16xf32>
    %c3_76 = arith.constant 3 : index
    %c0_77 = arith.constant 0 : index
    %c0_78 = arith.constant 0 : index
    %101 = vector.load %arg7[%c3_76, %c0_77, %c0_78] : memref<4x1x16xf32, #tpu.memory_space<vmem>>, vector<1x1x16xf32>
    %102 = vector.shape_cast %101 : vector<1x1x16xf32> to vector<1x16xf32>
    %cst_79 = arith.constant dense<0.000000e+00> : vector<8x64xf32>
    %103 = tpu.matmul %89, %92, %cst_79 {dimension_numbers = #tpu.dot_dimension_numbers<[1], [0], [0], [1], [0, 0, 1, 1], [], []>} : vector<8x16xf32>, vector<16x64xf32>, vector<8x64xf32> -> vector<8x64xf32>
    %104 = vector.broadcast %94 : vector<1x64xf32> to vector<8x64xf32>
    %105 = arith.addf %103, %104 : vector<8x64xf32>
    %106 = math.tanh %105 : vector<8x64xf32>
    %107 = vector.extract_strided_slice %106 {offsets = [0, 0], sizes = [8, 32], strides = [1, 1]} : vector<8x64xf32> to vector<8x32xf32>
    %108 = vector.extract_strided_slice %106 {offsets = [0, 32], sizes = [8, 32], strides = [1, 1]} : vector<8x64xf32> to vector<8x32xf32>
    %cst_80 = arith.constant dense<0.000000e+00> : vector<8x16xf32>
    %109 = tpu.matmul %107, %96, %cst_80 {dimension_numbers = #tpu.dot_dimension_numbers<[1], [0], [0], [1], [0, 0, 1, 1], [], []>} : vector<8x32xf32>, vector<32x16xf32>, vector<8x16xf32> -> vector<8x16xf32>
    %110 = vector.broadcast %98 : vector<1x16xf32> to vector<8x16xf32>
    %111 = arith.addf %109, %110 : vector<8x16xf32>
    %112 = math.tanh %111 : vector<8x16xf32>
    %cst_81 = arith.constant dense<0.000000e+00> : vector<8x16xf32>
    %113 = tpu.matmul %108, %100, %cst_81 {dimension_numbers = #tpu.dot_dimension_numbers<[1], [0], [0], [1], [0, 0, 1, 1], [], []>} : vector<8x32xf32>, vector<32x16xf32>, vector<8x16xf32> -> vector<8x16xf32>
    %114 = vector.broadcast %102 : vector<1x16xf32> to vector<8x16xf32>
    %115 = arith.addf %113, %114 : vector<8x16xf32>
    %116 = math.exp %112 : vector<8x16xf32>
    %117 = arith.mulf %60, %116 : vector<8x16xf32>
    %118 = arith.addf %117, %115 : vector<8x16xf32>
    %119 = arith.addf %90, %112 : vector<8x16xf32>
    %120 = tpu.concatenate %118, %89 in 1 : vector<8x16xf32>, vector<8x16xf32> -> vector<8x32xf32>
    %c0_82 = arith.constant 0 : index
    %c0_83 = arith.constant 0 : index
    %121 = vector.load %arg8[%c0_82, %c0_83] : memref<8x32xf32, #tpu.memory_space<vmem>>, vector<8x32xf32>
    tpu.vector_store %arg8[%c0_82, %c0_83], %120 {strides = array<i32>} : memref<8x32xf32, #tpu.memory_space<vmem>>, vector<8x32xf32>,
    %cst_84 = arith.constant dense<0.000000e+00> : vector<8xf32>
    %122 = vector.multi_reduction <add>, %119, %cst_84 [1] : vector<8x16xf32> to vector<8xf32>
    %123 = vector.shape_cast %122 : vector<8xf32> to vector<8x1xf32>
    %c0_85 = arith.constant 0 : index
    %c0_86 = arith.constant 0 : index
    %124 = vector.load %arg9[%c0_85, %c0_86] : memref<8x1xf32, #tpu.memory_space<vmem>>, vector<8x1xf32>
    tpu.vector_store %arg9[%c0_85, %c0_86], %123 {strides = array<i32>} : memref<8x1xf32, #tpu.memory_space<vmem>>, vector<8x1xf32>,
    return
  }
  func.func @transform_0(%arg0: i32) -> (i32, i32) {
    %c0_i32 = arith.constant 0 : i32
    %c0_i32_0 = arith.constant 0 : i32
    return %arg0, %c0_i32 : i32, i32
  }
  func.func @transform_1(%arg0: i32) -> (i32, i32, i32) {
    %c0_i32 = arith.constant 0 : i32
    %c0_i32_0 = arith.constant 0 : i32
    %c0_i32_1 = arith.constant 0 : i32
    %c0_i32_2 = arith.constant 0 : i32
    return %c0_i32, %c0_i32_0, %c0_i32_1 : i32, i32, i32
  }
  func.func @transform_2(%arg0: i32) -> (i32, i32, i32) {
    %c0_i32 = arith.constant 0 : i32
    %c0_i32_0 = arith.constant 0 : i32
    %c0_i32_1 = arith.constant 0 : i32
    %c0_i32_2 = arith.constant 0 : i32
    return %c0_i32, %c0_i32_0, %c0_i32_1 : i32, i32, i32
  }
  func.func @transform_3(%arg0: i32) -> (i32, i32, i32) {
    %c0_i32 = arith.constant 0 : i32
    %c0_i32_0 = arith.constant 0 : i32
    %c0_i32_1 = arith.constant 0 : i32
    %c0_i32_2 = arith.constant 0 : i32
    return %c0_i32, %c0_i32_0, %c0_i32_1 : i32, i32, i32
  }
  func.func @transform_4(%arg0: i32) -> (i32, i32, i32) {
    %c0_i32 = arith.constant 0 : i32
    %c0_i32_0 = arith.constant 0 : i32
    %c0_i32_1 = arith.constant 0 : i32
    %c0_i32_2 = arith.constant 0 : i32
    return %c0_i32, %c0_i32_0, %c0_i32_1 : i32, i32, i32
  }
  func.func @transform_5(%arg0: i32) -> (i32, i32, i32) {
    %c0_i32 = arith.constant 0 : i32
    %c0_i32_0 = arith.constant 0 : i32
    %c0_i32_1 = arith.constant 0 : i32
    %c0_i32_2 = arith.constant 0 : i32
    return %c0_i32, %c0_i32_0, %c0_i32_1 : i32, i32, i32
  }
  func.func @transform_6(%arg0: i32) -> (i32, i32, i32) {
    %c0_i32 = arith.constant 0 : i32
    %c0_i32_0 = arith.constant 0 : i32
    %c0_i32_1 = arith.constant 0 : i32
    %c0_i32_2 = arith.constant 0 : i32
    return %c0_i32, %c0_i32_0, %c0_i32_1 : i32, i32, i32
  }
  func.func @transform_7(%arg0: i32) -> (i32, i32) {
    %c0_i32 = arith.constant 0 : i32
    %c0_i32_0 = arith.constant 0 : i32
    return %arg0, %c0_i32 : i32, i32
  }
  func.func @transform_8(%arg0: i32) -> (i32, i32) {
    %c0_i32 = arith.constant 0 : i32
    %c0_i32_0 = arith.constant 0 : i32
    return %arg0, %c0_i32 : i32, i32
  }
}

</mosaic_0001>

<bundles_post_ra>
// kernel: tpu_custom_call.1
= control target key start
LH: loop header
LB: loop body
LE: loop exit
PB: predicated region body
PF: predicated region fallthrough
CT: control target
= control target key end

     0   :  { %vm46_vm0 = vcmask 130048   ;;  %s866_s0 = inlined_call_operand.vmem [shape: f32[8,32], index: 0, kind: input, shape index: {}]   ;;  %s867_s1 = inlined_call_operand.vmem [shape: f32[4,16,64], index: 1, kind: input, shape index: {}]   ;;  %s868_s2 = inlined_call_operand.vmem [shape: f32[4,1,64], index: 2, kind: input, shape index: {}]   ;;  %s869_s3 = inlined_call_operand.vmem [shape: f32[4,32,16], index: 3, kind: input, shape index: {}]   ;;  %s870_s4 = inlined_call_operand.vmem [shape: f32[4,1,16], index: 4, kind: input, shape index: {}]   ;;  %s871_s5 = inlined_call_operand.vmem [shape: f32[4,32,16], index: 5, kind: input, shape index: {}]   ;;  %s872_s6 = inlined_call_operand.vmem [shape: f32[4,1,16], index: 6, kind: input, shape index: {}]   ;;  %s873_s7 = inlined_call_operand.hbm [shape: f32[8,32], index: 7, kind: output, shape index: {0}]   ;;  %s874_s8 = inlined_call_operand.vmem [shape: f32[8,1], index: 8, kind: output, shape index: {1}]  }
   0x1   :  { %v31_v0 = vld [vmem:[%s867_s1 + $0x8] sm:$0xff]  ;;  %v30_v1 = vld [vmem:[%s867_s1] sm:$0xff] }
   0x2   :  { %64 = vmatpush.msra.mxu0 %v31_v0  ;;  %v668_v2 = vld [vmem:[%s866_s0] sm:$0xff] }
   0x4   :  { %65 = vmatpush.msra.mxu0 %v30_v1 }
   0x5   :  { %493 = vmatmul.msk.f32.vlgmr.msra.gmra.mxu0 %vm46_vm0, %v668_v2 }
   0x6   :  { %14 = vsyncpa [#allocation3], 0  ;;  %v36_v3 = vld [vmem:[%s869_s3 + $0x18] sm:$0xff]  ;;  %v35_v4 = vld [vmem:[%s869_s3 + $0x10] sm:$0xff]  ;;  %vm74_vm1 = vcmask 261120   ;;  %s610_s28 = smov 96  }
   0x7   :  { %90 = vmatpush.msra.mxu1 %v36_v3  ;;  %v34_v5 = vld [vmem:[%s869_s3 + $0x8] sm:$0xff]  ;;  %v33_v6 = vld [vmem:[%s869_s3] sm:$0xff]  ;;  %v41_v7 = vld [vmem:[%s871_s5 + $0x18] sm:$0xff]  ;;  %s611_s9 = smov 16   ;;  %s612_s16 = smov 112   ;;  %vm471_vm2 = vcmask 7168  }
   0x8   :  { %v40_v8 = vld [vmem:[%s871_s5 + $0x10] sm:$0xff]  ;;  %118 = vmatpush.msra.mxu2 %v41_v7  ;;  %v39_v9 = vld [vmem:[%s871_s5 + $0x8] sm:$0xff]  ;;  %v38_v10 = vld [vmem:[%s871_s5] sm:$0xff]  ;;  %s480_s26 = sshll.u32 %s873_s7, 4  ;;  %s481_s26 = int_to_ptr.hbm [resolvable:$true] %s480_s26 }
   0x9   :  { %91 = vmatpush.msra.mxu1 %v35_v4  ;;  %v548_v11 = vld [vmem:[%s868_s2] ss:$0 sm:$0xff]  ;;  %v497_v25 = vld [vmem:[%s867_s1 + $0x18] sm:$0xff]  ;;  %v496_v26 = vld [vmem:[%s867_s1 + $0x10] sm:$0xff] }
   0xa   :  { %119 = vmatpush.msra.mxu2 %v40_v8  ;;  %v549_v16 = vld [vmem:[%s870_s4] ss:$0 sm:$0xff]  ;;  %180 = vmatpush.msra.mxu3 %v497_v25  ;;  %v502_v32 = vld [vmem:[%s869_s3 + $0x38] sm:$0xff]  ;;  %v501_v33 = vld [vmem:[%s869_s3 + $0x30] sm:$0xff] }
   0xb   :  { %92 = vmatpush.msra.mxu1 %v34_v5  ;;  %v550_v22 = vld [vmem:[%s872_s6] ss:$0 sm:$0xff]  ;;  %205 = vmatpush.msrb.mxu0 %v502_v32  ;;  %v500_v34 = vld [vmem:[%s869_s3 + $0x28] sm:$0xff]  ;;  %v507_v36 = vld [vmem:[%s871_s5 + $0x38] sm:$0xff] }
   0xc   :  { %120 = vmatpush.msra.mxu2 %v39_v9  ;;  %181 = vmatpush.msra.mxu3 %v496_v26  ;;  %v499_v35 = vld [vmem:[%s869_s3 + $0x20] sm:$0xff]  ;;  %v506_v37 = vld [vmem:[%s871_s5 + $0x30] sm:$0xff]  ;;  %v505_v38 = vld [vmem:[%s871_s5 + $0x28] sm:$0xff] }
   0xd   :  { %93 = vmatpush.msra.mxu1 %v33_v6  ;;  %206 = vmatpush.msrb.mxu0 %v501_v33  ;;  %v504_v39 = vld [vmem:[%s871_s5 + $0x20] sm:$0xff]  ;;  %v513_v45 = vld [vmem:[%s867_s1 + $0x28] sm:$0xff]  ;;  %v518_v58 = vld [vmem:[%s869_s3 + $0x58] sm:$0xff] }
   0xe   :  { %121 = vmatpush.msra.mxu2 %v38_v10  ;;  %233 = vmatpush.msrb.mxu3 %v507_v36  ;;  %v551_v40 = vld [vmem:[%s868_s2 + $0x1] ss:$0 sm:$0xff]  ;;  %v517_v59 = vld [vmem:[%s869_s3 + $0x50] sm:$0xff]  ;;  %v516_v60 = vld [vmem:[%s869_s3 + $0x48] sm:$0xff] }
   0xf   :  { %207 = vmatpush.msrb.mxu0 %v500_v34  ;;  %285 = vmatpush.msrb.mxu1 %v513_v45  ;;  %v552_v46 = vld [vmem:[%s870_s4 + $0x1] ss:$0 sm:$0xff]  ;;  %v523_v62 = vld [vmem:[%s871_s5 + $0x58] sm:$0xff]  ;;  %v522_v63 = vld [vmem:[%s871_s5 + $0x50] sm:$0xff] }
  0x10   :  { %234 = vmatpush.msrb.mxu3 %v506_v37  ;;  %v512_v47 = vld [vmem:[%s867_s1 + $0x20] sm:$0xff]  ;;  %310 = vmatpush.msrb.mxu2 %v518_v58  ;;  %v521_v0 = vld [vmem:[%s871_s5 + $0x48] sm:$0xff]  ;;  %v534_v25 = vld [vmem:[%s869_s3 + $0x78] sm:$0xff] }
  0x11   :  { %208 = vmatpush.msrb.mxu0 %v499_v35  ;;  %286 = vmatpush.msrb.mxu1 %v512_v47  ;;  %v553_v52 = vld [vmem:[%s872_s6 + $0x1] ss:$0 sm:$0xff]  ;;  %v555_v7 = vld [vmem:[%s870_s4 + $0x2] ss:$0 sm:$0xff]  ;;  %v533_v26 = vld [vmem:[%s869_s3 + $0x70] sm:$0xff] }
  0x12   :  { %235 = vmatpush.msrb.mxu3 %v505_v38  ;;  %311 = vmatpush.msrb.mxu2 %v517_v59  ;;  %v515_v61 = vld [vmem:[%s869_s3 + $0x40] sm:$0xff] }
  0x13   :  { %338 = vmatpush.msra.mxu0 %v523_v62  ;;  %v520_v1 = vld [vmem:[%s871_s5 + $0x40] sm:$0xff] }
  0x14   :  { %236 = vmatpush.msrb.mxu3 %v504_v39  ;;  %312 = vmatpush.msrb.mxu2 %v516_v60  ;;  %v536_v32 = vld [vmem:[%s871_s5 + $0x60] sm:$0xff] }
  0x15   :  { %339 = vmatpush.msra.mxu0 %v522_v63  ;;  %v557_v33 = vld [vmem:[%s868_s2 + $0x3] ss:$0 sm:$0xff] }
  0x16   :  { %313 = vmatpush.msrb.mxu2 %v515_v61  ;;  %v558_v38 = vld [vmem:[%s870_s4 + $0x3] ss:$0 sm:$0xff]  ;;  %s613_s4 = smov [#allocation2]  }
  0x17   :  { %340 = vmatpush.msra.mxu0 %v521_v0  ;;  %v559_v45 = vld [vmem:[%s872_s6 + $0x3] ss:$0 sm:$0xff] }
  0x19   :  { %341 = vmatpush.msra.mxu0 %v520_v1 }
  0x82   :  { %v67_v12 = vpop.f32.mrf.mxu0 }
  0x83   :  { %v68_v13 = vadd.f32 %v548_v11, %v67_v12 }
  0x85   :  { %560 = vtanh.f32 %v68_v13 }
  0x8b   :  { %v561_v14 = vpop.eup %560 }
  0x8c   :  { %102 = vrot.lane.b32.xlu0 %v561_v14, %s610_s28  ;;  %494 = vmatmul.msk.f32.vlgmr.msra.gmra.mxu1 %vm74_vm1, %v561_v14 }
  0x8d   :  { %425 = vmatpush.msra.mxu1 %v534_v25 }
  0x8f   :  { %426 = vmatpush.msra.mxu1 %v533_v26 }
  0xfe   :  { %v103_v15 = vpop.permute.xlu0 %102 }
  0xff   :  { %495 = vmatmul.msk.f32.vlgmr.msra.gmra.mxu2 %vm74_vm1, %v103_v15  ;;  %v556_v15 = vld [vmem:[%s872_s6 + $0x2] ss:$0 sm:$0xff] }
 0x109   :  { %v95_v17 = vpop.f32.mrf.mxu1 }
 0x10a   :  { %v96_v18 = vadd.f32 %v549_v16, %v95_v17 }
 0x10c   :  { %562 = vtanh.f32 %v96_v18  ;;  %v529_v18 = vld [vmem:[%s867_s1 + $0x38] sm:$0xff] }
 0x112   :  { %v705_v19 = vpop.eup %562 }
 0x113   :  { %v126_v20 = vmul.f32 1.442695, %v705_v19 }
 0x115   :  { %564 = vpow2.f32 %v126_v20 }
 0x11b   :  { %v565_v21 = vpop.eup %564 }
 0x11c   :  { %129 = vrot.lane.b32.xlu0 %v565_v21, %s611_s9 }
 0x182   :  { %v123_v23 = vpop.f32.mrf.mxu2 }
 0x183   :  { %v124_v24 = vadd.f32 %v550_v22, %v123_v23 }
 0x185   :  { %134 = vrot.lane.b32.xlu1 %v124_v24, %s611_s9 }
 0x18e   :  { %v130_v27 = vpop.permute.xlu0 %129 }
 0x18f   :  { %v132_v28 = vmul.f32 %v130_v27, %v668_v2  ;;  %v532_v27 = vld [vmem:[%s869_s3 + $0x68] sm:$0xff] }
 0x190   :  { %427 = vmatpush.msra.mxu1 %v532_v27 }
 0x1f7   :  { %v135_v29 = vpop.permute.xlu1 %134 }
 0x1f8   :  { %v720_v30 = vadd.f32 %v135_v29, %v132_v28  ;;  %v531_v28 = vld [vmem:[%s869_s3 + $0x60] sm:$0xff]  ;;  %v539_v29 = vld [vmem:[%s871_s5 + $0x78] sm:$0xff] }
 0x1f9   :  { %428 = vmatpush.msra.mxu1 %v531_v28  ;;  %453 = vmatpush.msra.mxu2 %v539_v29 }
 0x1fa   :  { %162 = vrot.lane.b32.xlu1 %v720_v30, %s612_s16 }
 0x26c   :  { %v163_v31 = vpop.permute.xlu1 %162 }
 0x26d   :  { %509 = vmatmul.msk.f32.vlgmr.msra.gmra.mxu3 %vm46_vm0, %v163_v31  ;;  %v537_v31 = vld [vmem:[%s871_s5 + $0x68] sm:$0xff] }
 0x26e   :  { %400 = vmatpush.msra.mxu3 %v529_v18 }
 0x2f0   :  { %v183_v41 = vpop.f32.mrf.mxu3 }
 0x2f1   :  { %v184_v42 = vadd.f32 %v551_v40, %v183_v41 }
 0x2f3   :  { %566 = vtanh.f32 %v184_v42 }
 0x2f9   :  { %v567_v43 = vpop.eup %566 }
 0x2fa   :  { %217 = vrot.lane.b32.xlu2 %v567_v43, %s610_s28  ;;  %510 = vmatmul.msk.f32.vlgmr.msrb.gmra.mxu0 %vm74_vm1, %v567_v43 }
 0x354   :  { %v218_v44 = vpop.permute.xlu2 %217 }
 0x355   :  { %511 = vmatmul.msk.f32.vlgmr.msrb.gmra.mxu3 %vm74_vm1, %v218_v44 }
 0x377   :  { %v210_v48 = vpop.f32.mrf.mxu0 }
 0x378   :  { %v211_v49 = vadd.f32 %v552_v46, %v210_v48 }
 0x37a   :  { %568 = vtanh.f32 %v211_v49 }
 0x380   :  { %v569_v50 = vpop.eup %568 }
 0x381   :  { %v241_v51 = vmul.f32 1.442695, %v569_v50  ;;  %v245_v10 = vadd.f32 %v569_v50, %v705_v19  ;;  %v528_v19 = vld [vmem:[%s867_s1 + $0x30] sm:$0xff] }
 0x382   :  { %401 = vmatpush.msra.mxu3 %v528_v19 }
 0x383   :  { %570 = vpow2.f32 %v241_v51 }
 0x389   :  { %v571_v53 = vpop.eup %570 }
 0x38a   :  { %v243_v56 = vmul.f32 %v571_v53, %v668_v2  ;;  %v554_v2 = vld [vmem:[%s868_s2 + $0x2] ss:$0 sm:$0xff] }
 0x3d8   :  { %v238_v54 = vpop.f32.mrf.mxu3 }
 0x3d9   :  { %v239_v55 = vadd.f32 %v553_v52, %v238_v54 }
 0x3db   :  { %v768_v57 = vadd.f32 %v243_v56, %v239_v55 }
 0x3dd   :  { %525 = vmatmul.msk.f32.vlgmr.msrb.gmra.mxu1 %vm46_vm0, %v768_v57 }
 0x45a   :  { %v288_v3 = vpop.f32.mrf.mxu1 }
 0x45b   :  { %v289_v4 = vadd.f32 %v554_v2, %v288_v3 }
 0x45d   :  { %572 = vtanh.f32 %v289_v4 }
 0x463   :  { %v573_v5 = vpop.eup %572 }
 0x464   :  { %322 = vrot.lane.b32.xlu2 %v573_v5, %s610_s28  ;;  %526 = vmatmul.msk.f32.vlgmr.msrb.gmra.mxu2 %vm74_vm1, %v573_v5 }
 0x4be   :  { %v323_v6 = vpop.permute.xlu2 %322 }
 0x4bf   :  { %527 = vmatmul.msk.f32.vlgmr.msra.gmra.mxu0 %vm74_vm1, %v323_v6 }
 0x4e7   :  { %v315_v8 = vpop.f32.mrf.mxu2 }
 0x4e8   :  { %v316_v9 = vadd.f32 %v555_v7, %v315_v8 }
 0x4ea   :  { %574 = vtanh.f32 %v316_v9 }
 0x4f0   :  { %v575_v11 = vpop.eup %574 }
 0x4f1   :  { %v346_v12 = vmul.f32 1.442695, %v575_v11  ;;  %v358_v13 = vadd.f32 %v575_v11, %v245_v10 }
 0x4f3   :  { %576 = vpow2.f32 %v346_v12 }
 0x4f9   :  { %v577_v14 = vpop.eup %576 }
 0x4fa   :  { %349 = vrot.lane.b32.xlu0 %v577_v14, %s611_s9 }
 0x53c   :  { %v343_v16 = vpop.f32.mrf.mxu0 }
 0x53d   :  { %v344_v17 = vadd.f32 %v556_v15, %v343_v16 }
 0x53f   :  { %354 = vrot.lane.b32.xlu1 %v344_v17, %s611_s9 }
 0x56c   :  { %v350_v20 = vpop.permute.xlu0 %349 }
 0x56d   :  { %v352_v21 = vmul.f32 %v350_v20, %v720_v30  ;;  %v538_v30 = vld [vmem:[%s871_s5 + $0x70] sm:$0xff] }
 0x56e   :  { %454 = vmatpush.msra.mxu2 %v538_v30 }
 0x570   :  { %455 = vmatpush.msra.mxu2 %v537_v31 }
 0x572   :  { %456 = vmatpush.msra.mxu2 %v536_v32 }
 0x5b1   :  { %v355_v22 = vpop.permute.xlu1 %354 }
 0x5b2   :  { %v357_v23 = vadd.f32 %v355_v22, %v352_v21 }
 0x5b4   :  { %382 = vrot.lane.b32.xlu2 %v357_v23, %s612_s16 }
 0x60e   :  { %v383_v24 = vpop.permute.xlu2 %382 }
 0x60f   :  { %541 = vmatmul.msk.f32.vlgmr.msra.gmra.mxu3 %vm46_vm0, %v383_v24 }
 0x692   :  { %v403_v34 = vpop.f32.mrf.mxu3 }
 0x693   :  { %v404_v35 = vadd.f32 %v557_v33, %v403_v34 }
 0x695   :  { %578 = vtanh.f32 %v404_v35 }
 0x69b   :  { %v579_v36 = vpop.eup %578 }
 0x69c   :  { %437 = vrot.lane.b32.xlu0 %v579_v36, %s610_s28  ;;  %542 = vmatmul.msk.f32.vlgmr.msra.gmra.mxu1 %vm74_vm1, %v579_v36  ;;  %s478_s28 = sshll.u32 %s613_s4, 4  ;;  %s479_s28 = int_to_ptr.vmem [resolvable:$true] %s478_s28 }
 0x70e   :  { %v438_v37 = vpop.permute.xlu0 %437 }
 0x70f   :  { %543 = vmatmul.msk.f32.vlgmr.msra.gmra.mxu2 %vm74_vm1, %v438_v37 }
 0x719   :  { %v430_v39 = vpop.f32.mrf.mxu1 }
 0x71a   :  { %v431_v40 = vadd.f32 %v558_v38, %v430_v39 }
 0x71c   :  { %580 = vtanh.f32 %v431_v40 }
 0x722   :  { %v581_v41 = vpop.eup %580 }
 0x723   :  { %v465_v42 = vadd.f32 %v581_v41, %v358_v13  ;;  %v461_v44 = vmul.f32 1.442695, %v581_v41 }
 0x725   :  { %v468_v43 = vsel %vm46_vm0, %v465_v42, 0.0  ;;  %582 = vpow2.f32 %v461_v44 }
 0x726   :  { %469 = vadd.xlane.f32.xlu1 %v468_v43 }
 0x72b   :  { %v583_v46 = vpop.eup %582 }
 0x72c   :  { %v463_v49 = vmul.f32 %v583_v46, %v768_v57 }
 0x792   :  { %v458_v47 = vpop.f32.mrf.mxu2 }
 0x793   :  { %v459_v48 = vadd.f32 %v559_v45, %v458_v47 }
 0x795   :  { %v464_v50 = vadd.f32 %v463_v49, %v459_v48 }
 0x797   :  { %v466_v51 = vsel %vm46_vm0, %v464_v50, %v357_v23 }
 0x798   :  { %467 = vst.msk [vmem:[#allocation2] sm:$0xff] %vm74_vm1, %v466_v51 }
 0x799   :  { %v470_v52 = vpop.xlane.xlu1 %469  ;;  %483 = dma.vmem_to_hbm [thread:$0]  %s479_s28, 128, %s481_s26, [#allocation3]  }
 0x79a   :  { %472 = vst.msk [vmem:[%s874_s8] sm:$0xff] %vm471_vm2, %v470_v52 }
 0x79b   :  { %608 = dma.done.wait [#allocation3], 128  }
 0x79c   :  { %609 = vsyncadd [#allocation3], 4294967168 }
 0x79d   :  { %492 = vsyncpa [#allocation3], 1 }

</bundles_post_ra>
